<compile_context>
chip_gen: v6e
topology: v6e:2x2x1
jax: 0.10.0
libtpu: 0.0.40
codegen_flags: <defaults>
</compile_context>

<pallas_src>
import functools

import jax
import jax.numpy as jnp
from jax.experimental import pallas as pl
from jax.experimental.pallas import tpu as pltpu

# ----------------------------- configuration -------------------------------
IN_CHANNELS = 4
EDGE_DIM = 1
PREP = [32]            # layers_features_prep
GINE = [[32, 32]]      # gine_mlp_channels (single conv)
POST = [32, 16]        # layers_features_post
NEG_SLOPE = 0.01
HIDDEN = 32
# dropout = 0.0 -> Dropout layers are identity (eval semantics); eps = 0.

N_NODES = 16
N_EDGES = 48
BATCH = 8              # number of graphs batched through the grid
GRAPHS_PER_BLOCK = 2   # graphs stacked per grid step (amortizes step overhead)

# ----------------------- parameter-slab row layout --------------------------
# Each layer occupies rows [off, off+rows): [W (fan_in rows); b (1 row); 0-pad]
# rows are padded to a multiple of 8 so in-kernel slices are sublane-aligned.
def _pad8(n):
    return ((n + 7) // 8) * 8

_LAYER_FANIN = [IN_CHANNELS, EDGE_DIM, PREP[-1], GINE[0][0],
                GINE[0][1] + PREP[-1], POST[0]]
_LAYER_FANOUT = [PREP[0], GINE[0][0], GINE[0][0], GINE[0][1], POST[0], POST[1]]
_LAYER_ROWS = [_pad8(f + 1) for f in _LAYER_FANIN]          # [8, 8, 40, 40, 72, 40]
_LAYER_OFFS = [sum(_LAYER_ROWS[:i]) for i in range(len(_LAYER_ROWS))]
SLAB_ROWS = sum(_LAYER_ROWS)                                # 208
PREP_L, EDGE_L, NN1_L, NN2_L, POST1_L, POST2_L = range(6)


def _leaky(v, neg_slope):
    return jnp.where(v >= 0, v, neg_slope * v)


def _affine(act, w_ref, layer):
    """act @ W + b, with b folded into the slab as a 'ones'-column row."""
    off = _LAYER_OFFS[layer]
    rows = _LAYER_ROWS[layer]
    r, c = act.shape
    parts = [act, jnp.ones((r, 1), jnp.float32)]
    pad = rows - c - 1
    if pad > 0:
        parts.append(jnp.zeros((r, pad), jnp.float32))
    aug = jnp.concatenate(parts, axis=1)                     # (r, rows)
    return jnp.dot(aug, w_ref[off:off + rows, :],
                   preferred_element_type=jnp.float32)


# ------------------------------- kernel ------------------------------------
def gine_encoder_kernel(x_ref, edge_ref, ew_ref, w_ref, out_ref, *, neg_slope):
    f32 = jnp.float32
    n_nodes = x_ref.shape[0]          # G * N  (block-stacked graphs)
    n_edges = edge_ref.shape[0]       # G * E

    # ---- sequential_prep: Linear -> LeakyReLU ----
    h = _leaky(_affine(x_ref[...], w_ref, PREP_L), neg_slope)          # (Nb, H)

    # ---- GINEConv ----
    ea = _affine(ew_ref[...], w_ref, EDGE_L)                           # (Eb, H)

    edges = edge_ref[...]                                              # (Eb, 2) int32 (block-local)
    src = edges[:, 0:1]                                                # (Eb, 1)
    dst = edges[:, 1:2]                                                # (Eb, 1)
    col_ids = jax.lax.broadcasted_iota(jnp.int32, (n_edges, n_nodes), 1)

    # gather h[src] via one-hot matmul: gather[e, j] = (src_e == j)
    gather = (col_ids == src).astype(f32)                              # (Eb, Nb)
    h_src = jnp.dot(gather, h, preferred_element_type=f32)             # (Eb, H)

    # message = ReLU(x_j + edge_attr)
    msg = jnp.maximum(h_src + ea, 0.0)                                 # (Eb, H)

    # scatter-add over dst via one-hot matmul: scatter[i, e] = (dst_e == i)
    scatter_t = (col_ids == dst).astype(f32)                           # (Eb, Nb)
    aggr = jnp.dot(scatter_t.T, msg, preferred_element_type=f32)       # (Nb, H)

    # (1 + eps) * x_i + aggr, eps = 0
    z = h + aggr

    # GINEConv.nn: Linear -> LeakyReLU -> Linear -> Tanh
    y = _leaky(_affine(z, w_ref, NN1_L), neg_slope)
    y = jnp.tanh(_affine(y, w_ref, NN2_L))                             # (Nb, H)

    # ---- skip cat: x = cat((conv_out, residual), dim=1) ----
    xc = jnp.concatenate([y, h], axis=1)                               # (Nb, 2H)

    # ---- sequential_post: Linear -> LeakyReLU -> Linear -> Tanh ----
    p = _leaky(_affine(xc, w_ref, POST1_L), neg_slope)
    p = jnp.tanh(_affine(p, w_ref, POST2_L))                           # (Nb, H); cols >= OUT are 0-padded
    out_ref[...] = p[:, :out_ref.shape[1]]


# ------------------------------- wrapper ------------------------------------
def pack_params(params):
    """Fold the 12 weight/bias tensors into one (SLAB_ROWS, HIDDEN) f32 slab."""
    slab = jnp.zeros((SLAB_ROWS, HIDDEN), jnp.float32)
    for layer, (w, b) in enumerate(zip(params[0::2], params[1::2])):
        off = _LAYER_OFFS[layer]
        fan_in, fan_out = w.shape
        slab = slab.at[off:off + fan_in, :fan_out].set(w.astype(jnp.float32))
        slab = slab.at[off + fan_in, :fan_out].set(b.reshape(-1).astype(jnp.float32))
    return slab


def gine_encoder_forward(x, edge_index, edge_weight, w_slab,
                         graphs_per_block=GRAPHS_PER_BLOCK):
    """x: (B,N,Cin) f32; edge_index: (B,E,2) int32 (per-graph node ids);
       edge_weight: (B,E,EDGE_DIM) f32; w_slab: (SLAB_ROWS, HIDDEN) f32."""
    B, N, Cin = x.shape
    E = edge_index.shape[1]
    G = graphs_per_block
    assert B % G == 0, "BATCH must be divisible by GRAPHS_PER_BLOCK"
    OUT = POST[-1]
    grid = B // G
    Nb, Eb = G * N, G * E

    # Graphs are stacked inside each block; rewrite node ids to be block-local
    # so the one-hot gather/scatter masks become block-diagonal (no cross-talk).
    offs = (jnp.arange(B, dtype=jnp.int32) % G) * N
    edges_local = edge_index.astype(jnp.int32) + offs[:, None, None]

    x2 = x.reshape(B * N, Cin).astype(jnp.float32)
    e2 = edges_local.reshape(B * E, 2)
    ew2 = edge_weight.reshape(B * E, EDGE_DIM).astype(jnp.float32)

    flops_per_block = 2 * HIDDEN * (
        Nb * _LAYER_ROWS[PREP_L] + Eb * _LAYER_ROWS[EDGE_L]
        + Eb * Nb + Nb * Eb
        + Nb * _LAYER_ROWS[NN1_L] + Nb * _LAYER_ROWS[NN2_L]
        + Nb * _LAYER_ROWS[POST1_L] + Nb * _LAYER_ROWS[POST2_L])
    cost = pl.CostEstimate(
        flops=int(grid * flops_per_block),
        transcendentals=int(B * N * 2 * HIDDEN),
        bytes_accessed=int(4 * (x2.size + e2.size + ew2.size + w_slab.size
                                + B * N * OUT)))

    kernel = functools.partial(gine_encoder_kernel, neg_slope=NEG_SLOPE)

    out = pl.pallas_call(
        kernel,
        out_shape=jax.ShapeDtypeStruct((B * N, OUT), jnp.float32),
        grid_spec=pltpu.PrefetchScalarGridSpec(
            num_scalar_prefetch=0,
            grid=(grid,),
            in_specs=[
                pl.BlockSpec((Nb, Cin), lambda i: (i, 0)),          # nodes
                pl.BlockSpec((Eb, 2), lambda i: (i, 0)),            # src/dst packed
                pl.BlockSpec((Eb, EDGE_DIM), lambda i: (i, 0)),     # edge weights
                pl.BlockSpec((SLAB_ROWS, HIDDEN), lambda i: (0, 0)),  # resident params
            ],
            out_specs=pl.BlockSpec((Nb, OUT), lambda i: (i, 0)),
        ),
        compiler_params=pltpu.CompilerParams(
            dimension_semantics=("parallel",)),   # splits across TCs on v7x
        cost_estimate=cost,
    )(x2, e2, ew2, w_slab)
    return out.reshape(B, N, OUT)


# ------------------------- pure-JAX reference -------------------------------
def gine_encoder_reference(x, src, dst, edge_weight, params):
    (wprep, bprep, wedge, bedge, w1, b1, w2, b2, wp1, bp1, wp2, bp2) = params
    leaky = lambda v: jnp.where(v >= 0, v, NEG_SLOPE * v)
    h = leaky(x @ wprep + bprep)
    ea = edge_weight @ wedge + bedge
    msg = jnp.maximum(h[src] + ea, 0.0)
    aggr = jax.ops.segment_sum(msg, dst, num_segments=x.shape[0])
    z = h + aggr
    y = jnp.tanh(leaky(z @ w1 + b1) @ w2 + b2)
    xc = jnp.concatenate([y, h], axis=1)
    return jnp.tanh(leaky(xc @ wp1 + bp1) @ wp2 + bp2)


# -------------------------- deterministic init -------------------------------
def _linear_params(key, fan_in, fan_out):
    # PyTorch-style uniform(-1/sqrt(fan_in), 1/sqrt(fan_in)); weights stored
    # transposed as (in, out) so the forward computes x @ W + b.
    kw, kb = jax.random.split(key)
    bound = 1.0 / jnp.sqrt(jnp.float32(fan_in))
    w = jax.random.uniform(kw, (fan_in, fan_out), jnp.float32, -bound, bound)
    b = jax.random.uniform(kb, (1, fan_out), jnp.float32, -bound, bound)
    return w, b


def init_params(key):
    keys = jax.random.split(key, 6)
    params = []
    for k, fi, fo in zip(keys, _LAYER_FANIN, _LAYER_FANOUT):
        w, b = _linear_params(k, fi, fo)
        params += [w, b]
    return tuple(params)


# --------------------------------- main --------------------------------------
if __name__ == "__main__":
    root = jax.random.PRNGKey(0)
    kx, ke, kw, kp = jax.random.split(root, 4)

    x = jax.random.normal(kx, (BATCH, N_NODES, IN_CHANNELS), jnp.float32)
    edge_index = jax.random.randint(ke, (BATCH, N_EDGES, 2), 0, N_NODES, jnp.int32)
    edge_weight = jax.random.normal(kw, (BATCH, N_EDGES, EDGE_DIM), jnp.float32)

    params = init_params(kp)
    w_slab = pack_params(params)

    out = gine_encoder_forward(x, edge_index, edge_weight, w_slab)
    out = jax.block_until_ready(out)

    ref = jnp.stack([
        gine_encoder_reference(x[b], edge_index[b, :, 0], edge_index[b, :, 1],
                               edge_weight[b], params)
        for b in range(BATCH)])

    assert out.shape == (BATCH, N_NODES, POST[-1])
    assert jnp.allclose(out, ref, atol=1e-4, rtol=1e-4), "mismatch vs reference"

    print("KERNEL_OK")
</pallas_src>

<mosaic_0001>
module attributes {stable_mosaic.version = 11 : i64} {
  func.func @gine_encoder_kernel(%arg0: i32, %arg1: memref<32x4xf32, #tpu.memory_space<vmem>>, %arg2: memref<96x2xi32, #tpu.memory_space<vmem>>, %arg3: memref<96x1xf32, #tpu.memory_space<vmem>>, %arg4: memref<208x32xf32, #tpu.memory_space<vmem>>, %arg5: memref<32x16xf32, #tpu.memory_space<vmem>>) attributes {dimension_semantics = [#tpu.dimension_semantics<parallel>], iteration_bounds = array<i64: 4>, scalar_prefetch = 0 : i64, scratch_operands = 0 : i64, tpu.core_type = #tpu.core_type<tc>, window_params = [{transform_indices = @transform_0, window_bounds = array<i64: 32, 4>}, {transform_indices = @transform_1, window_bounds = array<i64: 96, 2>}, {transform_indices = @transform_2, window_bounds = array<i64: 96, 1>}, {pipeline_mode = #tpu.pipeline_mode<synchronous>, transform_indices = @transform_3, window_bounds = array<i64: 208, 32>}, {transform_indices = @transform_4, window_bounds = array<i64: 32, 16>}]} {
    %c0 = arith.constant 0 : index
    %c0_0 = arith.constant 0 : index
    %0 = vector.load %arg1[%c0, %c0_0] : memref<32x4xf32, #tpu.memory_space<vmem>>, vector<32x4xf32>
    %cst = arith.constant 1.000000e+00 : f32
    %1 = vector.broadcast %cst : f32 to vector<32x1xf32>
    %cst_1 = arith.constant 0.000000e+00 : f32
    %2 = vector.broadcast %cst_1 : f32 to vector<32x3xf32>
    %3 = tpu.concatenate %0, %1, %2 in 1 : vector<32x4xf32>, vector<32x1xf32>, vector<32x3xf32> -> vector<32x8xf32>
    %c0_2 = arith.constant 0 : index
    %c0_3 = arith.constant 0 : index
    %4 = vector.load %arg4[%c0_2, %c0_3] : memref<208x32xf32, #tpu.memory_space<vmem>>, vector<8x32xf32>
    %cst_4 = arith.constant dense<0.000000e+00> : vector<32x32xf32>
    %5 = tpu.matmul %3, %4, %cst_4 {dimension_numbers = #tpu.dot_dimension_numbers<[1], [0], [0], [1], [0, 0, 1, 1], [], []>} : vector<32x8xf32>, vector<8x32xf32>, vector<32x32xf32> -> vector<32x32xf32>
    %cst_5 = arith.constant 0.000000e+00 : f32
    %6 = vector.broadcast %cst_5 : f32 to vector<32x32xf32>
    %7 = arith.cmpf oge, %5, %6 : vector<32x32xf32>
    %cst_6 = arith.constant 0.00999999977 : f32
    %8 = vector.broadcast %cst_6 : f32 to vector<32x32xf32>
    %9 = arith.mulf %8, %5 : vector<32x32xf32>
    %10 = arith.select %7, %5, %9 : vector<32x32xi1>, vector<32x32xf32>
    %c0_7 = arith.constant 0 : index
    %c0_8 = arith.constant 0 : index
    %11 = vector.load %arg3[%c0_7, %c0_8] : memref<96x1xf32, #tpu.memory_space<vmem>>, vector<96x1xf32>
    %cst_9 = arith.constant 1.000000e+00 : f32
    %12 = vector.broadcast %cst_9 : f32 to vector<96x1xf32>
    %cst_10 = arith.constant 0.000000e+00 : f32
    %13 = vector.broadcast %cst_10 : f32 to vector<96x6xf32>
    %14 = tpu.concatenate %11, %12, %13 in 1 : vector<96x1xf32>, vector<96x1xf32>, vector<96x6xf32> -> vector<96x8xf32>
    %c8 = arith.constant 8 : index
    %c0_11 = arith.constant 0 : index
    %15 = vector.load %arg4[%c8, %c0_11] : memref<208x32xf32, #tpu.memory_space<vmem>>, vector<8x32xf32>
    %cst_12 = arith.constant dense<0.000000e+00> : vector<96x32xf32>
    %16 = tpu.matmul %14, %15, %cst_12 {dimension_numbers = #tpu.dot_dimension_numbers<[1], [0], [0], [1], [0, 0, 1, 1], [], []>} : vector<96x8xf32>, vector<8x32xf32>, vector<96x32xf32> -> vector<96x32xf32>
    %c0_13 = arith.constant 0 : index
    %c0_14 = arith.constant 0 : index
    %17 = vector.load %arg2[%c0_13, %c0_14] : memref<96x2xi32, #tpu.memory_space<vmem>>, vector<96x2xi32>
    %18 = vector.extract_strided_slice %17 {offsets = [0, 0], sizes = [96, 1], strides = [1, 1]} : vector<96x2xi32> to vector<96x1xi32>
    %19 = vector.extract_strided_slice %17 {offsets = [0, 1], sizes = [96, 1], strides = [1, 1]} : vector<96x2xi32> to vector<96x1xi32>
    %20 = tpu.iota {dimensions = array<i32: 1>} : vector<96x32xi32>
    %21 = vector.broadcast %18 : vector<96x1xi32> to vector<96x32xi32>
    %22 = arith.cmpi eq, %20, %21 : vector<96x32xi32>
    %23 = arith.extui %22 : vector<96x32xi1> to vector<96x32xi32>
    %24 = arith.sitofp %23 : vector<96x32xi32> to vector<96x32xf32>
    %cst_15 = arith.constant dense<0.000000e+00> : vector<96x32xf32>
    %25 = tpu.matmul %24, %10, %cst_15 {dimension_numbers = #tpu.dot_dimension_numbers<[1], [0], [0], [1], [0, 0, 1, 1], [], []>} : vector<96x32xf32>, vector<32x32xf32>, vector<96x32xf32> -> vector<96x32xf32>
    %26 = arith.addf %25, %16 : vector<96x32xf32>
    %cst_16 = arith.constant 0.000000e+00 : f32
    %27 = vector.broadcast %cst_16 : f32 to vector<96x32xf32>
    %28 = arith.maximumf %26, %27 : vector<96x32xf32>
    %29 = vector.broadcast %19 : vector<96x1xi32> to vector<96x32xi32>
    %30 = arith.cmpi eq, %20, %29 : vector<96x32xi32>
    %31 = arith.extui %30 : vector<96x32xi1> to vector<96x32xi32>
    %32 = arith.sitofp %31 : vector<96x32xi32> to vector<96x32xf32>
    %33 = tpu.transpose %32, [1, 0] : vector<96x32xf32> -> vector<32x96xf32>
    %cst_17 = arith.constant dense<0.000000e+00> : vector<32x32xf32>
    %34 = tpu.matmul %33, %28, %cst_17 {dimension_numbers = #tpu.dot_dimension_numbers<[1], [0], [0], [1], [0, 0, 1, 1], [], []>} : vector<32x96xf32>, vector<96x32xf32>, vector<32x32xf32> -> vector<32x32xf32>
    %35 = arith.addf %10, %34 : vector<32x32xf32>
    %cst_18 = arith.constant 1.000000e+00 : f32
    %36 = vector.broadcast %cst_18 : f32 to vector<32x1xf32>
    %cst_19 = arith.constant 0.000000e+00 : f32
    %37 = vector.broadcast %cst_19 : f32 to vector<32x7xf32>
    %38 = tpu.concatenate %35, %36, %37 in 1 : vector<32x32xf32>, vector<32x1xf32>, vector<32x7xf32> -> vector<32x40xf32>
    %c16 = arith.constant 16 : index
    %c0_20 = arith.constant 0 : index
    %39 = vector.load %arg4[%c16, %c0_20] : memref<208x32xf32, #tpu.memory_space<vmem>>, vector<40x32xf32>
    %cst_21 = arith.constant dense<0.000000e+00> : vector<32x32xf32>
    %40 = tpu.matmul %38, %39, %cst_21 {dimension_numbers = #tpu.dot_dimension_numbers<[1], [0], [0], [1], [0, 0, 1, 1], [], []>} : vector<32x40xf32>, vector<40x32xf32>, vector<32x32xf32> -> vector<32x32xf32>
    %cst_22 = arith.constant 0.000000e+00 : f32
    %41 = vector.broadcast %cst_22 : f32 to vector<32x32xf32>
    %42 = arith.cmpf oge, %40, %41 : vector<32x32xf32>
    %cst_23 = arith.constant 0.00999999977 : f32
    %43 = vector.broadcast %cst_23 : f32 to vector<32x32xf32>
    %44 = arith.mulf %43, %40 : vector<32x32xf32>
    %45 = arith.select %42, %40, %44 : vector<32x32xi1>, vector<32x32xf32>
    %cst_24 = arith.constant 1.000000e+00 : f32
    %46 = vector.broadcast %cst_24 : f32 to vector<32x1xf32>
    %cst_25 = arith.constant 0.000000e+00 : f32
    %47 = vector.broadcast %cst_25 : f32 to vector<32x7xf32>
    %48 = tpu.concatenate %45, %46, %47 in 1 : vector<32x32xf32>, vector<32x1xf32>, vector<32x7xf32> -> vector<32x40xf32>
    %c56 = arith.constant 56 : index
    %c0_26 = arith.constant 0 : index
    %49 = vector.load %arg4[%c56, %c0_26] : memref<208x32xf32, #tpu.memory_space<vmem>>, vector<40x32xf32>
    %cst_27 = arith.constant dense<0.000000e+00> : vector<32x32xf32>
    %50 = tpu.matmul %48, %49, %cst_27 {dimension_numbers = #tpu.dot_dimension_numbers<[1], [0], [0], [1], [0, 0, 1, 1], [], []>} : vector<32x40xf32>, vector<40x32xf32>, vector<32x32xf32> -> vector<32x32xf32>
    %51 = math.tanh %50 : vector<32x32xf32>
    %52 = tpu.concatenate %51, %10 in 1 : vector<32x32xf32>, vector<32x32xf32> -> vector<32x64xf32>
    %cst_28 = arith.constant 1.000000e+00 : f32
    %53 = vector.broadcast %cst_28 : f32 to vector<32x1xf32>
    %cst_29 = arith.constant 0.000000e+00 : f32
    %54 = vector.broadcast %cst_29 : f32 to vector<32x7xf32>
    %55 = tpu.concatenate %52, %53, %54 in 1 : vector<32x64xf32>, vector<32x1xf32>, vector<32x7xf32> -> vector<32x72xf32>
    %c96 = arith.constant 96 : index
    %c0_30 = arith.constant 0 : index
    %56 = vector.load %arg4[%c96, %c0_30] : memref<208x32xf32, #tpu.memory_space<vmem>>, vector<72x32xf32>
    %cst_31 = arith.constant dense<0.000000e+00> : vector<32x32xf32>
    %57 = tpu.matmul %55, %56, %cst_31 {dimension_numbers = #tpu.dot_dimension_numbers<[1], [0], [0], [1], [0, 0, 1, 1], [], []>} : vector<32x72xf32>, vector<72x32xf32>, vector<32x32xf32> -> vector<32x32xf32>
    %cst_32 = arith.constant 0.000000e+00 : f32
    %58 = vector.broadcast %cst_32 : f32 to vector<32x32xf32>
    %59 = arith.cmpf oge, %57, %58 : vector<32x32xf32>
    %cst_33 = arith.constant 0.00999999977 : f32
    %60 = vector.broadcast %cst_33 : f32 to vector<32x32xf32>
    %61 = arith.mulf %60, %57 : vector<32x32xf32>
    %62 = arith.select %59, %57, %61 : vector<32x32xi1>, vector<32x32xf32>
    %cst_34 = arith.constant 1.000000e+00 : f32
    %63 = vector.broadcast %cst_34 : f32 to vector<32x1xf32>
    %cst_35 = arith.constant 0.000000e+00 : f32
    %64 = vector.broadcast %cst_35 : f32 to vector<32x7xf32>
    %65 = tpu.concatenate %62, %63, %64 in 1 : vector<32x32xf32>, vector<32x1xf32>, vector<32x7xf32> -> vector<32x40xf32>
    %c168 = arith.constant 168 : index
    %c0_36 = arith.constant 0 : index
    %66 = vector.load %arg4[%c168, %c0_36] : memref<208x32xf32, #tpu.memory_space<vmem>>, vector<40x32xf32>
    %cst_37 = arith.constant dense<0.000000e+00> : vector<32x32xf32>
    %67 = tpu.matmul %65, %66, %cst_37 {dimension_numbers = #tpu.dot_dimension_numbers<[1], [0], [0], [1], [0, 0, 1, 1], [], []>} : vector<32x40xf32>, vector<40x32xf32>, vector<32x32xf32> -> vector<32x32xf32>
    %68 = math.tanh %67 : vector<32x32xf32>
    %69 = vector.extract_strided_slice %68 {offsets = [0, 0], sizes = [32, 16], strides = [1, 1]} : vector<32x32xf32> to vector<32x16xf32>
    %c0_38 = arith.constant 0 : index
    %c0_39 = arith.constant 0 : index
    %70 = vector.load %arg5[%c0_38, %c0_39] : memref<32x16xf32, #tpu.memory_space<vmem>>, vector<32x16xf32>
    tpu.vector_store %arg5[%c0_38, %c0_39], %69 {strides = array<i32>} : memref<32x16xf32, #tpu.memory_space<vmem>>, vector<32x16xf32>,
    return
  }
  func.func @transform_0(%arg0: i32) -> (i32, i32) {
    %c0_i32 = arith.constant 0 : i32
    %c0_i32_0 = arith.constant 0 : i32
    return %arg0, %c0_i32 : i32, i32
  }
  func.func @transform_1(%arg0: i32) -> (i32, i32) {
    %c0_i32 = arith.constant 0 : i32
    %c0_i32_0 = arith.constant 0 : i32
    return %arg0, %c0_i32 : i32, i32
  }
  func.func @transform_2(%arg0: i32) -> (i32, i32) {
    %c0_i32 = arith.constant 0 : i32
    %c0_i32_0 = arith.constant 0 : i32
    return %arg0, %c0_i32 : i32, i32
  }
  func.func @transform_3(%arg0: i32) -> (i32, i32) {
    %c0_i32 = arith.constant 0 : i32
    %c0_i32_0 = arith.constant 0 : i32
    %c0_i32_1 = arith.constant 0 : i32
    return %c0_i32, %c0_i32_0 : i32, i32
  }
  func.func @transform_4(%arg0: i32) -> (i32, i32) {
    %c0_i32 = arith.constant 0 : i32
    %c0_i32_0 = arith.constant 0 : i32
    return %arg0, %c0_i32 : i32, i32
  }
}

</mosaic_0001>

<bundles_post_ra>
// kernel: tpu_custom_call.1
= control target key start
LH: loop header
LB: loop body
LE: loop exit
PB: predicated region body
PF: predicated region fallthrough
CT: control target
= control target key end

     0   :  { %s2022_s15 = smov 0   ;;  %s2370_s0 = inlined_call_operand.vmem [shape: f32[128,4], index: 0, kind: input, shape index: {}]   ;;  %s2371_s1 = inlined_call_operand.vmem [shape: s32[384,2], index: 1, kind: input, shape index: {}]   ;;  %s2372_s2 = inlined_call_operand.vmem [shape: f32[384,1], index: 2, kind: input, shape index: {}]   ;;  %s2373_s3 = inlined_call_operand.vmem [shape: f32[208,32], index: 3, kind: input, shape index: {}]   ;;  %s2374_s4 = inlined_call_operand.vmem [shape: f32[128,16], index: 4, kind: output, shape index: {}]  }
   0x1 LB: > { %s1622_s16 = sadd.s32 4294967295, %s1991_s15   ;;  %p1626_p0 = scmp.ge.s32.totalorder %s1991_s15, 1  ;;  %s1991_s15 = sphi %s2022_s15, %s14_s15  }
   0x2   : > { %p185_p1 = scmp.lt.s32.totalorder %s1991_s15, 5 }
   0x4   : > { %p186_p2 = pnand %p1626_p0, %p185_p1 }
   0x5   : > { %s1627_s19 = sshll.u32 (!%p186_p2), %s1622_s16, 2  ;;  %s227_s20 = smul.u32 (!%p186_p2), 12, %s1622_s16 }
   0x6   : > { %189 = sbr.rel (%p186_p2) target bundleno = 1496 (0x5d8), region = 36  ;;  %p222_p3 = scmp.lt.s32.totalorder (!%p186_p2), %s1627_s19, 15 }
   0x7   : > { %p228_p4 = scmp.lt.s32.totalorder (!%p186_p2), %s227_s20, 47  ;;  %s1996_s8 = smov (!%p186_p2), 32  }
   0xb   : > { %v259_v0 = vld [vmem:[%s2373_s3] sm:$0xff]  ;;  %v1993_v1 = vmov 0   ;;  %s2376_s19 = smov (!%p222_p3, %s1627_s19), 15  ;;  %vm249_vm0 = vcmask 31744   ;;  %vm254_vm1 = vcmask 39936   ;;  %vm260_vm2 = vcmask 64512  }
   0xc   : > { %1797 = vmatprep.subr.mxu0 %v259_v0  ;;  %1965 = vset.pattern.permute.xlu0 %v1993_v1  ;;  %s1628_s21 = sshll.u32 %s2376_s19, 3  ;;  %s2378_s20 = smov (!%p228_p4, %s227_s20), 47  ;;  %v1994_v26 = vmov 1   ;;  %vm382_vm3 = vcmask 7168   ;;  %v408_v28 = vld [vmem:[%s2373_s3 + $0x8] sm:$0xff]  ;;  %vm395_vm4 = vcmask 15360  }
   0xd   : > { %1798 = vmatpush3.msra.mxu0 %v259_v0  ;;  %1966 = vset.pattern.permute.xlu1 %v1993_v1  ;;  %s225_s24 = scalar_lea.vmem %s2370_s0, %s1628_s21  ;;  %s1629_s25 = sshll.u32 %s2378_s20, 3  ;;  %v582_v0 = vlaneseq  ;;  %vm656_vm5 = vcmask 261120  }
   0xe   : > { %v245_v2 = vld [vmem:[%s225_s24] sm:$0xff]  ;;  %v246_v3 = vld [vmem:[%s225_s24 + $0x8] sm:$0xff]  ;;  %v247_v4 = vld [vmem:[%s225_s24 + $0x10] sm:$0xff]  ;;  %s231_s28 = scalar_lea.vmem %s2371_s1, %s1629_s25  ;;  %s2062_s5 = scalar_lea.vmem %s2372_s2, %s1629_s25  ;;  %1805 = vmatprep.subr.mxu1 %v408_v28 }
   0xf   : > { %v250_v5 = vsel %vm249_vm0, %v245_v2, 1.0  ;;  %v251_v6 = vsel %vm249_vm0, %v246_v3, 1.0  ;;  %v252_v7 = vsel %vm249_vm0, %v247_v4, 1.0  ;;  %v248_v8 = vld [vmem:[%s225_s24 + $0x18] sm:$0xff]  ;;  %v570_v13 = vld [vmem:[%s231_s28] sm:$0xff]  ;;  %v572_v14 = vld [vmem:[%s231_s28 + $0x10] sm:$0xff]  ;;  %1806 = vmatpush3.msra.mxu1 %v408_v28  ;;  %s243_s13 = scalar_lea.vmem %s2374_s4, %s1628_s21 }
  0x10   : > { %v255_v9 = vsel %vm254_vm1, %v250_v5, 0.0  ;;  %v256_v10 = vsel %vm254_vm1, %v251_v6, 0.0  ;;  %v257_v11 = vsel %vm254_vm1, %v252_v7, 0.0  ;;  %v253_v12 = vsel %vm249_vm0, %v248_v8, 1.0  ;;  %585 = vperm.xlu0 %1965, %v570_v13   ;;  %591 = vperm.xlu1 %1966, %v572_v14   ;;  %v571_v16 = vld [vmem:[%s231_s28 + $0x8] sm:$0xff]  ;;  %v573_v17 = vld [vmem:[%s231_s28 + $0x18] sm:$0xff] }
  0x11   : > { %1799 = vmatprep.mubr.msk.f32.mxu0 %vm260_vm2, %v255_v9  ;;  %v258_v15 = vsel %vm254_vm1, %v253_v12, 0.0  ;;  %v574_v18 = vld [vmem:[%s231_s28 + $0x20] sm:$0xff]  ;;  %v575_v19 = vld [vmem:[%s231_s28 + $0x28] sm:$0xff]  ;;  %v576_v20 = vld [vmem:[%s231_s28 + $0x30] sm:$0xff]  ;;  %v2115_v1 = vand.u32 127, %v582_v0  ;;  %v1995_v4 = vmov 0.0  }
  0x12   : > { %1800 = vmatmul.mubr.msk.f32.vlgmr.msra.gmra.mxu0 %vm260_vm2, %v256_v10  ;;  %v577_v21 = vld [vmem:[%s231_s28 + $0x38] sm:$0xff]  ;;  %v578_v22 = vld [vmem:[%s231_s28 + $0x40] sm:$0xff]  ;;  %v579_v23 = vld [vmem:[%s231_s28 + $0x48] sm:$0xff] }
  0x13   : > { %1802 = vmatprep.mubr.msk.f32.mxu0 %vm260_vm2, %v257_v11  ;;  %v580_v24 = vld [vmem:[%s231_s28 + $0x50] sm:$0xff]  ;;  %v581_v25 = vld [vmem:[%s231_s28 + $0x58] sm:$0xff]  ;;  %v370_v27 = vld [vmem:[%s2062_s5] sm:$0xff] }
  0x14   : > { %588 = vperm.xlu0 %1965, %v571_v16   ;;  %594 = vperm.xlu1 %1966, %v573_v17   ;;  %v383_v29 = vsel %vm382_vm3, %v370_v27, 1.0  ;;  %v371_v30 = vld [vmem:[%s2062_s5 + $0x8] sm:$0xff]  ;;  %v372_v34 = vld [vmem:[%s2062_s5 + $0x10] sm:$0xff]  ;;  %v373_v36 = vld [vmem:[%s2062_s5 + $0x18] sm:$0xff] }
  0x15   : > { %v396_v31 = vsel %vm395_vm4, %v383_v29, 0.0  ;;  %v384_v32 = vsel %vm382_vm3, %v371_v30, 1.0  ;;  %v385_v35 = vsel %vm382_vm3, %v372_v34, 1.0  ;;  %v386_v38 = vsel %vm382_vm3, %v373_v36, 1.0  ;;  %v374_v40 = vld [vmem:[%s2062_s5 + $0x20] sm:$0xff]  ;;  %v375_v42 = vld [vmem:[%s2062_s5 + $0x28] sm:$0xff] }
  0x16   : > { %1803 = vmatmul.mubr.msk.f32.gmra.mxu0 %vm260_vm2, %v258_v15  ;;  %1807 = vmatprep.mubr.msk.f32.mxu1 %vm260_vm2, %v396_v31  ;;  %v397_v33 = vsel %vm395_vm4, %v384_v32, 0.0  ;;  %v398_v37 = vsel %vm395_vm4, %v385_v35, 0.0  ;;  %v399_v39 = vsel %vm395_vm4, %v386_v38, 0.0  ;;  %v387_v41 = vsel %vm382_vm3, %v374_v40, 1.0  ;;  %v376_v46 = vld [vmem:[%s2062_s5 + $0x30] sm:$0xff]  ;;  %v377_v48 = vld [vmem:[%s2062_s5 + $0x38] sm:$0xff] }
  0x17   : > { %1808 = vmatmul.mubr.msk.f32.vlgmr.msra.gmra.mxu1 %vm260_vm2, %v397_v33  ;;  %v400_v43 = vsel %vm395_vm4, %v387_v41, 0.0  ;;  %v388_v44 = vsel %vm382_vm3, %v375_v42, 1.0  ;;  %v389_v47 = vsel %vm382_vm3, %v376_v46, 1.0  ;;  %v390_v50 = vsel %vm382_vm3, %v377_v48, 1.0  ;;  %v378_v52 = vld [vmem:[%s2062_s5 + $0x40] sm:$0xff]  ;;  %v379_v54 = vld [vmem:[%s2062_s5 + $0x48] sm:$0xff] }
  0x18   : > { %597 = vperm.xlu0 %1965, %v574_v18   ;;  %600 = vperm.xlu1 %1966, %v575_v19   ;;  %v401_v45 = vsel %vm395_vm4, %v388_v44, 0.0  ;;  %v402_v49 = vsel %vm395_vm4, %v389_v47, 0.0  ;;  %v403_v51 = vsel %vm395_vm4, %v390_v50, 0.0  ;;  %v391_v53 = vsel %vm382_vm3, %v378_v52, 1.0  ;;  %v380_v58 = vld [vmem:[%s2062_s5 + $0x50] sm:$0xff]  ;;  %v381_v60 = vld [vmem:[%s2062_s5 + $0x58] sm:$0xff] }
  0x19   : > { %1810 = vmatprep.mubr.msk.f32.mxu1 %vm260_vm2, %v398_v37  ;;  %v404_v55 = vsel %vm395_vm4, %v391_v53, 0.0  ;;  %v392_v56 = vsel %vm382_vm3, %v379_v54, 1.0  ;;  %v393_v59 = vsel %vm382_vm3, %v380_v58, 1.0  ;;  %v394_v62 = vsel %vm382_vm3, %v381_v60, 1.0  ;;  %v1049_v0 = vld [vmem:[%s2373_s3 + $0x30] sm:$0xff] }
  0x1a   : > { %v405_v57 = vsel %vm395_vm4, %v392_v56, 0.0  ;;  %v406_v61 = vsel %vm395_vm4, %v393_v59, 0.0  ;;  %v407_v63 = vsel %vm395_vm4, %v394_v62, 0.0 }
  0x1b   : > { %1811 = vmatmul.mubr.msk.f32.gmra.mxu1 %vm260_vm2, %v399_v39 }
  0x1c   : > { %603 = vperm.xlu0 %1965, %v576_v20   ;;  %606 = vperm.xlu1 %1966, %v577_v21  }
  0x1d   : > { %1813 = vmatprep.mubr.msk.f32.mxu1 %vm260_vm2, %v400_v43 }
  0x1f   : > { %1814 = vmatmul.mubr.msk.f32.gmra.mxu1 %vm260_vm2, %v401_v45 }
  0x20   : > { %609 = vperm.xlu0 %1965, %v578_v22   ;;  %612 = vperm.xlu1 %1966, %v579_v23  }
  0x21   : > { %1816 = vmatprep.mubr.msk.f32.mxu1 %vm260_vm2, %v402_v49 }
  0x23   : > { %1817 = vmatmul.mubr.msk.f32.gmra.mxu1 %vm260_vm2, %v403_v51 }
  0x24   : > { %615 = vperm.xlu0 %1965, %v580_v24   ;;  %618 = vperm.xlu1 %1966, %v581_v25  }
  0x25   : > { %1819 = vmatprep.mubr.msk.f32.mxu1 %vm260_vm2, %v404_v55 }
  0x27   : > { %1820 = vmatmul.mubr.msk.f32.gmra.mxu1 %vm260_vm2, %v405_v57 }
  0x28   : > { %1967 = vset.pattern.permute.xlu0 %v1994_v26  ;;  %1968 = vset.pattern.permute.xlu1 %v1994_v26 }
  0x29   : > { %831 = vperm.xlu0 %1967, %v570_v13   ;;  %834 = vperm.xlu1 %1968, %v571_v16  }
  0x2a   : > { %1822 = vmatprep.mubr.msk.f32.mxu1 %vm260_vm2, %v406_v61 }
  0x2b   : > { %1823 = vmatmul.mubr.msk.f32.gmra.mxu1 %vm260_vm2, %v407_v63 }
  0x2d   : > { %840 = vperm.xlu0 %1967, %v573_v17   ;;  %837 = vperm.xlu1 %1968, %v572_v14  }
  0x31   : > { %846 = vperm.xlu0 %1967, %v575_v19   ;;  %843 = vperm.xlu1 %1968, %v574_v18  }
  0x35   : > { %852 = vperm.xlu0 %1967, %v577_v21   ;;  %849 = vperm.xlu1 %1968, %v576_v20  }
  0x39   : > { %858 = vperm.xlu0 %1967, %v579_v23   ;;  %855 = vperm.xlu1 %1968, %v578_v22  }
  0x3d   : > { %864 = vperm.xlu0 %1967, %v581_v25   ;;  %861 = vperm.xlu1 %1968, %v580_v24  }
  0x8b   : > { %v586_v2 = vpop.permute.xlu0 %585  ;;  %v592_v3 = vpop.permute.xlu1 %591 }
  0x8c   : > { %vm620_vm6 = vcmp.eq.s32.totalorder %v2115_v1, %v586_v2  ;;  %vm622_vm7 = vcmp.eq.s32.totalorder %v2115_v1, %v592_v3  ;;  %v1047_v2 = vld [vmem:[%s2373_s3 + $0x20] sm:$0xff]  ;;  %v1046_v3 = vld [vmem:[%s2373_s3 + $0x18] sm:$0xff] }
  0x8d   : > { %v1649_v5 = vsel %vm620_vm6, 1.0, %v1995_v4  ;;  %v2121_v6 = vsel %vm622_vm7, 1.0, %v1995_v4 }
  0x8e   : > { %1833 = vmatprep.mubr.msk.f32.mxu0 %vm656_vm5, %v1649_v5 }
  0x8f   : > { %v589_v7 = vpop.permute.xlu0 %588  ;;  %v595_v8 = vpop.permute.xlu1 %594 }
  0x90   : > { %vm621_vm8 = vcmp.eq.s32.totalorder %v2115_v1, %v589_v7  ;;  %vm623_vm9 = vcmp.eq.s32.totalorder %v2115_v1, %v595_v8 }
  0x91   : > { %v2126_v9 = vsel %vm621_vm8, 1.0, %v1995_v4  ;;  %v2130_v10 = vsel %vm623_vm9, 1.0, %v1995_v4 }
  0x93   : > { %v598_v11 = vpop.permute.xlu0 %597  ;;  %v601_v12 = vpop.permute.xlu1 %600 }
  0x94   : > { %vm624_vm10 = vcmp.eq.s32.totalorder %v2115_v1, %v598_v11  ;;  %vm625_vm11 = vcmp.eq.s32.totalorder %v2115_v1, %v601_v12 }
  0x95   : > { %v2134_v13 = vsel %vm624_vm10, 1.0, %v1995_v4  ;;  %v2138_v14 = vsel %vm625_vm11, 1.0, %v1995_v4 }
  0x97   : > { %v604_v15 = vpop.permute.xlu0 %603  ;;  %v607_v16 = vpop.permute.xlu1 %606 }
  0x98   : > { %vm626_vm12 = vcmp.eq.s32.totalorder %v2115_v1, %v604_v15  ;;  %vm627_vm13 = vcmp.eq.s32.totalorder %v2115_v1, %v607_v16 }
  0x99   : > { %v2142_v17 = vsel %vm626_vm12, 1.0, %v1995_v4  ;;  %v2146_v18 = vsel %vm627_vm13, 1.0, %v1995_v4 }
  0x9b   : > { %v610_v19 = vpop.permute.xlu0 %609  ;;  %v613_v20 = vpop.permute.xlu1 %612 }
  0x9c   : > { %vm628_vm14 = vcmp.eq.s32.totalorder %v2115_v1, %v610_v19  ;;  %vm629_vm15 = vcmp.eq.s32.totalorder %v2115_v1, %v613_v20 }
  0x9d   : > { %v2150_v21 = vsel %vm628_vm14, 1.0, %v1995_v4  ;;  %v2154_v22 = vsel %vm629_vm15, 1.0, %v1995_v4 }
  0x9f   : > { %v616_v23 = vpop.permute.xlu0 %615  ;;  %v619_v24 = vpop.permute.xlu1 %618 }
  0xa0   : > { %vm630_vm0 = vcmp.eq.s32.totalorder %v2115_v1, %v616_v23  ;;  %vm631_vm1 = vcmp.eq.s32.totalorder %v2115_v1, %v619_v24 }
  0xa1   : > { %v2158_v25 = vsel %vm630_vm0, 1.0, %v1995_v4  ;;  %v2162_v26 = vsel %vm631_vm1, 1.0, %v1995_v4 }
  0xa4   : > { %v832_v27 = vpop.permute.xlu0 %831  ;;  %v835_v28 = vpop.permute.xlu1 %834 }
  0xa5   : > { %vm866_vm2 = vcmp.eq.s32.totalorder %v2115_v1, %v832_v27  ;;  %vm867_vm3 = vcmp.eq.s32.totalorder %v2115_v1, %v835_v28 }
  0xa6   : > { %v1673_v29 = vsel %vm866_vm2, 1.0, %v1995_v4  ;;  %v1674_v30 = vsel %vm867_vm3, 1.0, %v1995_v4  ;;  %vm934_vm3 = vcmask 785408  }
  0xa7   : > { %902 = vxpose.xlu1.b32.start [1/12] (short) (narrow) %v1673_v29, 32 }
  0xa8   : > { %v841_v31 = vpop.permute.xlu0 %840  ;;  %v838_v32 = vpop.permute.xlu1 %837 }
  0xa9   : > { %vm868_vm4 = vcmp.eq.s32.totalorder %v2115_v1, %v838_v32  ;;  %vm869_vm6 = vcmp.eq.s32.totalorder %v2115_v1, %v841_v31 }
  0xaa   : > { %v1675_v33 = vsel %vm868_vm4, 1.0, %v1995_v4  ;;  %v1676_v36 = vsel %vm869_vm6, 1.0, %v1995_v4  ;;  %vm1040_vm4 = vcmask 269312   ;;  %vm1050_vm6 = vcmask 326656  }
  0xab   : > { %903 = vxpose.xlu1.b32.cont [2/12] (short) (narrow) %v1674_v30, 32 }
  0xac   : > { %v847_v34 = vpop.permute.xlu0 %846  ;;  %v844_v35 = vpop.permute.xlu1 %843 }
  0xad   : > { %vm870_vm7 = vcmp.eq.s32.totalorder %v2115_v1, %v844_v35  ;;  %vm871_vm8 = vcmp.eq.s32.totalorder %v2115_v1, %v847_v34 }
  0xae   : > { %v1677_v39 = vsel %vm870_vm7, 1.0, %v1995_v4  ;;  %v1678_v42 = vsel %vm871_vm8, 1.0, %v1995_v4 }
  0xaf   : > { %904 = vxpose.xlu1.b32.cont [3/12] (short) (narrow) %v1675_v33, 32 }
  0xb0   : > { %v853_v37 = vpop.permute.xlu0 %852  ;;  %v850_v38 = vpop.permute.xlu1 %849 }
  0xb1   : > { %vm872_vm9 = vcmp.eq.s32.totalorder %v2115_v1, %v850_v38  ;;  %vm873_vm12 = vcmp.eq.s32.totalorder %v2115_v1, %v853_v37 }
  0xb2   : > { %v1679_v47 = vsel %vm872_vm9, 1.0, %v1995_v4  ;;  %v1680_v48 = vsel %vm873_vm12, 1.0, %v1995_v4  ;;  %vm1299_vm12 = vcmask 531456  }
  0xb3   : > { %905 = vxpose.xlu1.b32.cont [4/12] (short) (narrow) %v1676_v36, 32 }
  0xb4   : > { %v859_v40 = vpop.permute.xlu0 %858  ;;  %v856_v41 = vpop.permute.xlu1 %855 }
  0xb5   : > { %vm874_vm13 = vcmp.eq.s32.totalorder %v2115_v1, %v856_v41  ;;  %vm875_vm14 = vcmp.eq.s32.totalorder %v2115_v1, %v859_v40 }
  0xb6   : > { %v1681_v49 = vsel %vm874_vm13, 1.0, %v1995_v4  ;;  %v1682_v50 = vsel %vm875_vm14, 1.0, %v1995_v4  ;;  %vm1313_vm13 = vcmask 588800  }
  0xb7   : > { %906 = vxpose.xlu1.b32.cont [5/12] (short) (narrow) %v1677_v39, 32 }
  0xb8   : > { %v865_v43 = vpop.permute.xlu0 %864  ;;  %v862_v44 = vpop.permute.xlu1 %861 }
  0xb9   : > { %vm877_vm10 = vcmp.eq.s32.totalorder %v2115_v1, %v865_v43  ;;  %vm876_vm11 = vcmp.eq.s32.totalorder %v2115_v1, %v862_v44  ;;  %v1048_v1 = vld [vmem:[%s2373_s3 + $0x28] sm:$0xff] }
  0xba   : > { %v1684_v45 = vsel %vm877_vm10, 1.0, %v1995_v4  ;;  %v1683_v46 = vsel %vm876_vm11, 1.0, %v1995_v4  ;;  %vm1294_vm11 = vcmask 523264  }
  0xbb   : > { %907 = vxpose.xlu1.b32.cont [6/12] (short) (narrow) %v1678_v42, 32 }
  0xbf   : > { %908 = vxpose.xlu1.b32.cont [7/12] (short) (narrow) %v1679_v47, 32 }
  0xc3   : > { %909 = vxpose.xlu1.b32.cont [8/12] (short) (narrow) %v1680_v48, 32 }
  0xc7   : > { %910 = vxpose.xlu1.b32.cont [9/12] (short) (narrow) %v1681_v49, 32 }
  0xcb   : > { %911 = vxpose.xlu1.b32.cont [10/12] (short) (narrow) %v1682_v50, 32 }
  0xcf   : > { %912 = vxpose.xlu1.b32.cont [11/12] (short) (narrow) %v1683_v46, 32 }
  0xd2   : > { %v1801_v51 = vpop.f32.mrf.mxu0 }
  0xd3   : > { %vm359_vm15 = vcmp.ge.f32.partialorder %v1801_v51, 0.0  ;;  %v363_v52 = vmul.f32 0.01, %v1801_v51  ;;  %913 = vxpose.xlu1.b32.end [12/12] (short) (narrow) %v1684_v45, 32 }
  0xd4   : > { %v339_v53 = vpop.f32.mrf.mxu0 }
  0xd5   : > { %v362_v54 = vmul.f32 0.01, %v339_v53  ;;  %v2188_v55 = vsel %vm359_vm15, %v1801_v51, %v363_v52  ;;  %vm358_vm0 = vcmp.ge.f32.partialorder %v339_v53, 0.0 }
  0xd6   : > { %1280 = vrot.lane.b32.xlu0 %v2188_v55, %s1996_s8  ;;  %v1804_v56 = vpop.f32.mrf.mxu0 }
  0xd7   : > { %vm361_vm1 = vcmp.ge.f32.partialorder %v1804_v56, 0.0  ;;  %v365_v57 = vmul.f32 0.01, %v1804_v56  ;;  %v2191_v60 = vsel %vm358_vm0, %v339_v53, %v362_v54  ;;  %v1809_v4 = vpop.f32.mrf.mxu1 }
  0xd8   : > { %v349_v58 = vpop.f32.mrf.mxu0 }
  0xd9   : > { %vm360_vm2 = vcmp.ge.f32.partialorder %v349_v58, 0.0  ;;  %v364_v59 = vmul.f32 0.01, %v349_v58  ;;  %v2193_v61 = vsel %vm361_vm1, %v1804_v56, %v365_v57  ;;  %v511_v5 = vpop.f32.mrf.mxu1  ;;  %v1045_v56 = vld [vmem:[%s2373_s3 + $0x10] sm:$0xff]  ;;  %v1172_v57 = vld [vmem:[%s2373_s3 + $0x58] sm:$0xff] }
  0xda   : > { %1278 = vrot.lane.b32.xlu0 %v2191_v60, %s1996_s8  ;;  %1825 = vmatprep.subr.mxu0 %v2193_v61 }
  0xdb   : > { %1826 = vmatpush3.msra.mxu0 %v2193_v61  ;;  %v2198_v62 = vsel %vm360_vm2, %v349_v58, %v364_v59 }
  0xdc   : > { %1827 = vmatprep.subr.mxu0 %v2198_v62 }
  0xdd   : > { %1828 = vmatpush3.msra.mxu0 %v2198_v62 }
  0xde   : > { %1282 = vrot.lane.b32.xlu0 %v2198_v62, %s1996_s8  ;;  %1829 = vmatprep.subr.mxu0 %v2188_v55 }
  0xdf   : > { %1830 = vmatpush3.msra.mxu0 %v2188_v55 }
  0xe0   : > { %1831 = vmatprep.subr.mxu0 %v2191_v60 }
  0xe1   : > { %1832 = vmatpush3.msra.mxu0 %v2191_v60 }
  0xe2   : > { %1284 = vrot.lane.b32.xlu0 %v2193_v61, %s1996_s8  ;;  %1834 = vmatmul.mubr.msk.f32.vlgmr.msra.gmra.mxu0 %vm656_vm5, %v2126_v9 }
  0xe3   : > { %1836 = vmatprep.mubr.msk.f32.mxu0 %vm656_vm5, %v2121_v6  ;;  %1881 = vmatprep.subr.mxu0 %v1049_v0  ;;  %v1812_v6 = vpop.f32.mrf.mxu1 }
  0xe4   : > { %1882 = vmatpush3.msra.mxu0 %v1049_v0 }
  0xe5   : > { %1883 = vmatprep.subr.mxu0 %v1048_v1  ;;  %v521_v7 = vpop.f32.mrf.mxu1 }
  0xe6   : > { %1837 = vmatmul.mubr.msk.f32.gmra.mxu0 %vm656_vm5, %v2130_v10 }
  0xe7   : > { %1839 = vmatprep.mubr.msk.f32.mxu0 %vm656_vm5, %v2134_v13  ;;  %1884 = vmatpush3.msra.mxu0 %v1048_v1  ;;  %v1815_v8 = vpop.f32.mrf.mxu1 }
  0xe8   : > { %1885 = vmatprep.subr.mxu0 %v1047_v2 }
  0xe9   : > { %1886 = vmatpush3.msra.mxu0 %v1047_v2  ;;  %v531_v9 = vpop.f32.mrf.mxu1 }
  0xea   : > { %1840 = vmatmul.mubr.msk.f32.gmra.mxu0 %vm656_vm5, %v2138_v14  ;;  %1887 = vmatprep.subr.mxu0 %v1046_v3 }
  0xeb   : > { %1842 = vmatprep.mubr.msk.f32.mxu0 %vm656_vm5, %v2142_v17  ;;  %1888 = vmatpush3.msra.mxu0 %v1046_v3  ;;  %v1818_v12 = vpop.f32.mrf.mxu1 }
  0xec   : > { %1889 = vmatprep.subr.mxu0 %v1045_v56 }
  0xed   : > { %v541_v15 = vpop.f32.mrf.mxu1  ;;  %1890 = vmatpush3.msra.mxu0 %v1045_v56 }
  0xee   : > { %1843 = vmatmul.mubr.msk.f32.gmra.mxu0 %vm656_vm5, %v2146_v18 }
  0xef   : > { %1845 = vmatprep.mubr.msk.f32.mxu0 %vm656_vm5, %v2150_v21  ;;  %v1821_v18 = vpop.f32.mrf.mxu1 }
  0xf1   : > { %v551_v21 = vpop.f32.mrf.mxu1 }
  0xf2   : > { %1846 = vmatmul.mubr.msk.f32.gmra.mxu0 %vm656_vm5, %v2154_v22 }
  0xf3   : > { %1848 = vmatprep.mubr.msk.f32.mxu0 %vm656_vm5, %v2158_v25  ;;  %v1824_v23 = vpop.f32.mrf.mxu1 }
  0xf5   : > { %v561_v27 = vpop.f32.mrf.mxu1 }
  0xf6   : > { %1849 = vmatmul.mubr.msk.f32.gmra.mxu0 %vm656_vm5, %v2162_v26 }
 0x123   : > { %v918_v63 = vpop.trf.xlu1 }
 0x124   : > { %1875 = vmatprep.mubr.msk.f32.mxu1 %vm934_vm3, %v918_v63 }
 0x127   : > { %v919_v46 = vpop.trf.xlu1 }
 0x12b   : > { %v920_v52 = vpop.trf.xlu1 }
 0x12f   : > { %v921_v54 = vpop.trf.xlu1 }
 0x1a2   : > { %v1835_v10 = vpop.f32.mrf.mxu0 }
 0x1a3   : > { %v765_v47 = vadd.f32 %v1835_v10, %v1809_v4  ;;  %v1170_v10 = vld [vmem:[%s2373_s3 + $0x48] sm:$0xff] }
 0x1a4   : > { %v759_v11 = vpop.f32.mrf.mxu0 }
 0x1a5   : > { %v760_v49 = vadd.f32 %v759_v11, %v511_v5  ;;  %v819_v51 = vmax.f32 %v765_v47, 0.0  ;;  %v1169_v11 = vld [vmem:[%s2373_s3 + $0x40] sm:$0xff] }
 0x1a6   : > { %v1838_v13 = vpop.f32.mrf.mxu0 }
 0x1a7   : > { %v775_v42 = vadd.f32 %v1838_v13, %v1812_v6  ;;  %v818_v53 = vmax.f32 %v760_v49, 0.0 }
 0x1a8   : > { %v769_v14 = vpop.f32.mrf.mxu0 }
 0x1a9   : > { %v770_v44 = vadd.f32 %v769_v14, %v521_v7  ;;  %v821_v48 = vmax.f32 %v775_v42, 0.0  ;;  %v1435_v42 = vld [vmem:[%s2373_s3 + $0xc8] sm:$0xff] }
 0x1aa   : > { %v1841_v16 = vpop.f32.mrf.mxu0 }
 0x1ab   : > { %v785_v38 = vadd.f32 %v1841_v16, %v1815_v8  ;;  %v820_v50 = vmax.f32 %v770_v44, 0.0 }
 0x1ac   : > { %v779_v17 = vpop.f32.mrf.mxu0 }
 0x1ad   : > { %v780_v40 = vadd.f32 %v779_v17, %v531_v9  ;;  %v823_v43 = vmax.f32 %v785_v38, 0.0  ;;  %v1307_v38 = vld [vmem:[%s2373_s3 + $0x78] sm:$0xff] }
 0x1ae   : > { %v1844_v19 = vpop.f32.mrf.mxu0 }
 0x1af   : > { %v795_v34 = vadd.f32 %v1844_v19, %v1818_v12  ;;  %v822_v45 = vmax.f32 %v780_v40, 0.0  ;;  %v1168_v12 = vld [vmem:[%s2373_s3 + $0x38] sm:$0xff]  ;;  %v1305_v40 = vld [vmem:[%s2373_s3 + $0x68] sm:$0xff] }
 0x1b0   : > { %v789_v20 = vpop.f32.mrf.mxu0 }
 0x1b1   : > { %v790_v36 = vadd.f32 %v789_v20, %v541_v15  ;;  %v825_v39 = vmax.f32 %v795_v34, 0.0  ;;  %v1311_v34 = vld [vmem:[%s2373_s3 + $0x98] sm:$0xff] }
 0x1b2   : > { %v1847_v22 = vpop.f32.mrf.mxu0 }
 0x1b3   : > { %v805_v29 = vadd.f32 %v1847_v22, %v1821_v18  ;;  %v824_v41 = vmax.f32 %v790_v36, 0.0  ;;  %v1309_v36 = vld [vmem:[%s2373_s3 + $0x88] sm:$0xff] }
 0x1b4   : > { %v799_v24 = vpop.f32.mrf.mxu0 }
 0x1b5   : > { %v800_v32 = vadd.f32 %v799_v24, %v551_v21  ;;  %v827_v35 = vmax.f32 %v805_v29, 0.0 }
 0x1b6   : > { %v1850_v25 = vpop.f32.mrf.mxu0 }
 0x1b7   : > { %v815_v26 = vadd.f32 %v1850_v25, %v1824_v23  ;;  %v826_v37 = vmax.f32 %v800_v32, 0.0 }
 0x1b8   : > { %v809_v28 = vpop.f32.mrf.mxu0 }
 0x1b9   : > { %v829_v30 = vmax.f32 %v815_v26, 0.0  ;;  %v810_v31 = vadd.f32 %v809_v28, %v561_v27 }
 0x1bb   : > { %v828_v33 = vmax.f32 %v810_v31, 0.0  ;;  %1851 = vmatprep.subr.mxu1 %v829_v30 }
 0x1bc   : > { %1852 = vmatpush3.msra.mxu1 %v829_v30 }
 0x1bd   : > { %1853 = vmatprep.subr.mxu1 %v828_v33 }
 0x1be   : > { %1854 = vmatpush3.msra.mxu1 %v828_v33  ;;  %v1312_v33 = vld [vmem:[%s2373_s3 + $0xa0] sm:$0xff] }
 0x1bf   : > { %1855 = vmatprep.subr.mxu1 %v827_v35  ;;  %1913 = vmatprep.subr.mxu0 %v1312_v33 }
 0x1c0   : > { %1856 = vmatpush3.msra.mxu1 %v827_v35  ;;  %v1310_v35 = vld [vmem:[%s2373_s3 + $0x90] sm:$0xff] }
 0x1c1   : > { %1857 = vmatprep.subr.mxu1 %v826_v37 }
 0x1c2   : > { %1858 = vmatpush3.msra.mxu1 %v826_v37  ;;  %v1308_v37 = vld [vmem:[%s2373_s3 + $0x80] sm:$0xff] }
 0x1c3   : > { %1859 = vmatprep.subr.mxu1 %v825_v39 }
 0x1c4   : > { %1860 = vmatpush3.msra.mxu1 %v825_v39  ;;  %v1306_v39 = vld [vmem:[%s2373_s3 + $0x70] sm:$0xff] }
 0x1c5   : > { %1861 = vmatprep.subr.mxu1 %v824_v41 }
 0x1c6   : > { %1862 = vmatpush3.msra.mxu1 %v824_v41  ;;  %v1304_v41 = vld [vmem:[%s2373_s3 + $0x60] sm:$0xff] }
 0x1c7   : > { %1863 = vmatprep.subr.mxu1 %v823_v43 }
 0x1c8   : > { %1864 = vmatpush3.msra.mxu1 %v823_v43  ;;  %v1281_v43 = vpop.permute.xlu0 %1280 }
 0x1c9   : > { %1865 = vmatprep.subr.mxu1 %v822_v45 }
 0x1ca   : > { %1866 = vmatpush3.msra.mxu1 %v822_v45 }
 0x1cb   : > { %1867 = vmatprep.subr.mxu1 %v821_v48 }
 0x1cc   : > { %1868 = vmatpush3.msra.mxu1 %v821_v48  ;;  %v1279_v47 = vpop.permute.xlu0 %1278 }
 0x1cd   : > { %1869 = vmatprep.subr.mxu1 %v820_v50 }
 0x1ce   : > { %1870 = vmatpush3.msra.mxu1 %v820_v50 }
 0x1cf   : > { %1871 = vmatprep.subr.mxu1 %v819_v51 }
 0x1d0   : > { %1872 = vmatpush3.msra.mxu1 %v819_v51  ;;  %v1283_v49 = vpop.permute.xlu0 %1282 }
 0x1d1   : > { %1873 = vmatprep.subr.mxu1 %v818_v53 }
 0x1d2   : > { %1874 = vmatpush3.msra.mxu1 %v818_v53 }
 0x1d3   : > { %1876 = vmatmul.mubr.msk.f32.vlgmr.msra.gmra.mxu1 %vm934_vm3, %v919_v46  ;;  %1897 = vmatprep.subr.mxu1 %v1172_v57 }
 0x1d4   : > { %1878 = vmatprep.mubr.msk.f32.mxu1 %vm934_vm3, %v920_v52  ;;  %1898 = vmatpush3.msra.mxu1 %v1172_v57  ;;  %v1285_v57 = vpop.permute.xlu0 %1284 }
 0x1d7   : > { %1879 = vmatmul.mubr.msk.f32.gmra.mxu1 %vm934_vm3, %v921_v54 }
 0x293   : > { %v1877_v58 = vpop.f32.mrf.mxu1 }
 0x294   : > { %v1033_v59 = vadd.f32 %v1877_v58, %v2188_v55 }
 0x295   : > { %v1013_v63 = vpop.f32.mrf.mxu1 }
 0x296   : > { %v1032_v0 = vadd.f32 %v1013_v63, %v2191_v60  ;;  %v1037_v1 = vsel %vm656_vm5, %v1033_v59, 1.0 }
 0x297   : > { %v1880_v2 = vpop.f32.mrf.mxu1  ;;  %v1042_v7 = vsel %vm1040_vm4, %v1037_v1, 0.0 }
 0x298   : > { %v1036_v3 = vsel %vm656_vm5, %v1032_v0, 1.0  ;;  %v1035_v4 = vadd.f32 %v1880_v2, %v2193_v61 }
 0x299   : > { %v1023_v5 = vpop.f32.mrf.mxu1  ;;  %v1041_v6 = vsel %vm1040_vm4, %v1036_v3, 0.0 }
 0x29a   : > { %v1034_v8 = vadd.f32 %v1023_v5, %v2198_v62  ;;  %1891 = vmatprep.mubr.msk.f32.mxu0 %vm1050_vm6, %v1041_v6  ;;  %v1039_v55 = vsel %vm656_vm5, %v1035_v4, 1.0  ;;  %v1171_v62 = vld [vmem:[%s2373_s3 + $0x50] sm:$0xff] }
 0x29b   : > { %1892 = vmatmul.mubr.msk.f32.vlgmr.msra.gmra.mxu0 %vm1050_vm6, %v1042_v7  ;;  %v1044_v61 = vsel %vm1040_vm4, %v1039_v55, 0.0  ;;  %1899 = vmatprep.subr.mxu1 %v1171_v62  ;;  %v1434_v7 = vld [vmem:[%s2373_s3 + $0xc0] sm:$0xff]  ;;  %v1432_v55 = vld [vmem:[%s2373_s3 + $0xb0] sm:$0xff] }
 0x29c   : > { %v1038_v60 = vsel %vm656_vm5, %v1034_v8, 1.0  ;;  %1900 = vmatpush3.msra.mxu1 %v1171_v62  ;;  %1914 = vmatpush3.msra.mxu0 %v1312_v33  ;;  %v1433_v8 = vld [vmem:[%s2373_s3 + $0xb8] sm:$0xff] }
 0x29d   : > { %v1043_v9 = vsel %vm1040_vm4, %v1038_v60, 0.0  ;;  %1901 = vmatprep.subr.mxu1 %v1170_v10  ;;  %1915 = vmatprep.subr.mxu0 %v1311_v34  ;;  %v1431_v60 = vld [vmem:[%s2373_s3 + $0xa8] sm:$0xff] }
 0x29e   : > { %1894 = vmatprep.mubr.msk.f32.mxu0 %vm1050_vm6, %v1043_v9  ;;  %1902 = vmatpush3.msra.mxu1 %v1170_v10 }
 0x29f   : > { %1895 = vmatmul.mubr.msk.f32.gmra.mxu0 %vm1050_vm6, %v1044_v61  ;;  %1903 = vmatprep.subr.mxu1 %v1169_v11 }
 0x2a0   : > { %1904 = vmatpush3.msra.mxu1 %v1169_v11  ;;  %1916 = vmatpush3.msra.mxu0 %v1311_v34 }
 0x2a1   : > { %1905 = vmatprep.subr.mxu1 %v1168_v12  ;;  %1917 = vmatprep.subr.mxu0 %v1310_v35 }
 0x2a2   : > { %1906 = vmatpush3.msra.mxu1 %v1168_v12  ;;  %1918 = vmatpush3.msra.mxu0 %v1310_v35 }
 0x2a3   : > { %1919 = vmatprep.subr.mxu0 %v1309_v36  ;;  %1937 = vmatprep.subr.mxu1 %v1435_v42 }
 0x2a4   : > { %1920 = vmatpush3.msra.mxu0 %v1309_v36 }
 0x2a5   : > { %1921 = vmatprep.subr.mxu0 %v1308_v37 }
 0x2a6   : > { %1922 = vmatpush3.msra.mxu0 %v1308_v37 }
 0x2a7   : > { %1923 = vmatprep.subr.mxu0 %v1307_v38 }
 0x2a8   : > { %1924 = vmatpush3.msra.mxu0 %v1307_v38 }
 0x2a9   : > { %1925 = vmatprep.subr.mxu0 %v1306_v39 }
 0x2aa   : > { %1926 = vmatpush3.msra.mxu0 %v1306_v39 }
 0x2ab   : > { %1927 = vmatprep.subr.mxu0 %v1305_v40 }
 0x2ac   : > { %1928 = vmatpush3.msra.mxu0 %v1305_v40 }
 0x2ad   : > { %1929 = vmatprep.subr.mxu0 %v1304_v41 }
 0x2ae   : > { %1930 = vmatpush3.msra.mxu0 %v1304_v41 }
 0x35b   : > { %v1893_v13 = vpop.f32.mrf.mxu0 }
 0x35c   : > { %vm1149_vm7 = vcmp.ge.f32.partialorder %v1893_v13, 0.0  ;;  %v1153_v14 = vmul.f32 0.01, %v1893_v13 }
 0x35d   : > { %v1129_v15 = vpop.f32.mrf.mxu0 }
 0x35e   : > { %v1157_v16 = vsel %vm1149_vm7, %v1893_v13, %v1153_v14  ;;  %vm1148_vm8 = vcmp.ge.f32.partialorder %v1129_v15, 0.0  ;;  %v1152_v17 = vmul.f32 0.01, %v1129_v15 }
 0x35f   : > { %v1896_v18 = vpop.f32.mrf.mxu0  ;;  %v1161_v19 = vsel %vm656_vm5, %v1157_v16, 1.0 }
 0x360   : > { %v1156_v20 = vsel %vm1148_vm8, %v1129_v15, %v1152_v17  ;;  %vm1151_vm9 = vcmp.ge.f32.partialorder %v1896_v18, 0.0  ;;  %v1155_v21 = vmul.f32 0.01, %v1896_v18  ;;  %v1165_v27 = vsel %vm1040_vm4, %v1161_v19, 0.0 }
 0x361   : > { %v1139_v22 = vpop.f32.mrf.mxu0  ;;  %v1160_v23 = vsel %vm656_vm5, %v1156_v20, 1.0 }
 0x362   : > { %v1159_v24 = vsel %vm1151_vm9, %v1896_v18, %v1155_v21  ;;  %vm1150_vm10 = vcmp.ge.f32.partialorder %v1139_v22, 0.0  ;;  %v1154_v25 = vmul.f32 0.01, %v1139_v22  ;;  %v1164_v26 = vsel %vm1040_vm4, %v1160_v23, 0.0 }
 0x363   : > { %1907 = vmatprep.mubr.msk.f32.mxu1 %vm1050_vm6, %v1164_v26  ;;  %v1163_v29 = vsel %vm656_vm5, %v1159_v24, 1.0 }
 0x364   : > { %v1158_v28 = vsel %vm1150_vm10, %v1139_v22, %v1154_v25  ;;  %1908 = vmatmul.mubr.msk.f32.vlgmr.msra.gmra.mxu1 %vm1050_vm6, %v1165_v27  ;;  %v1167_v32 = vsel %vm1040_vm4, %v1163_v29, 0.0 }
 0x365   : > { %v1162_v30 = vsel %vm656_vm5, %v1158_v28, 1.0  ;;  %1938 = vmatpush3.msra.mxu1 %v1435_v42 }
 0x366   : > { %v1166_v31 = vsel %vm1040_vm4, %v1162_v30, 0.0  ;;  %1939 = vmatprep.subr.mxu1 %v1434_v7 }
 0x367   : > { %1910 = vmatprep.mubr.msk.f32.mxu1 %vm1050_vm6, %v1166_v31  ;;  %1940 = vmatpush3.msra.mxu1 %v1434_v7 }
 0x368   : > { %1911 = vmatmul.mubr.msk.f32.gmra.mxu1 %vm1050_vm6, %v1167_v32  ;;  %1941 = vmatprep.subr.mxu1 %v1433_v8 }
 0x369   : > { %1942 = vmatpush3.msra.mxu1 %v1433_v8 }
 0x36a   : > { %1943 = vmatprep.subr.mxu1 %v1432_v55 }
 0x36b   : > { %1944 = vmatpush3.msra.mxu1 %v1432_v55 }
 0x36c   : > { %1945 = vmatprep.subr.mxu1 %v1431_v60 }
 0x36d   : > { %1946 = vmatpush3.msra.mxu1 %v1431_v60 }
 0x424   : > { %v1909_v44 = vpop.f32.mrf.mxu1 }
 0x425   : > { %1969 = vtanh.f32 %v1909_v44 }
 0x426   : > { %v1251_v45 = vpop.f32.mrf.mxu1 }
 0x427   : > { %1971 = vtanh.f32 %v1251_v45 }
 0x428   : > { %v1912_v46 = vpop.f32.mrf.mxu1 }
 0x429   : > { %1973 = vtanh.f32 %v1912_v46 }
 0x42a   : > { %v1261_v48 = vpop.f32.mrf.mxu1 }
 0x42b   : > { %1975 = vtanh.f32 %v1261_v48 }
 0x432   : > { %v1970_v50 = vpop.eup %1969 }
 0x433   : > { %v1291_v51 = vsel %vm656_vm5, %v1970_v50, %v1281_v43 }
 0x434   : > { %v1972_v52 = vpop.eup %1971  ;;  %v1296_v54 = vsel %vm1294_vm11, %v1291_v51, 1.0 }
 0x435   : > { %v1290_v53 = vsel %vm656_vm5, %v1972_v52, %v1279_v47  ;;  %v1301_v1 = vsel %vm1299_vm12, %v1296_v54, 0.0 }
 0x436   : > { %v1974_v56 = vpop.eup %1973  ;;  %v1295_v58 = vsel %vm1294_vm11, %v1290_v53, 1.0 }
 0x437   : > { %v1300_v59 = vsel %vm1299_vm12, %v1295_v58, 0.0  ;;  %v1293_v63 = vsel %vm656_vm5, %v1974_v56, %v1285_v57 }
 0x438   : > { %v1976_v0 = vpop.eup %1975  ;;  %1931 = vmatprep.mubr.msk.f32.mxu0 %vm1313_vm13, %v1300_v59  ;;  %v1298_v3 = vsel %vm1294_vm11, %v1293_v63, 1.0 }
 0x439   : > { %1932 = vmatmul.mubr.msk.f32.vlgmr.msra.gmra.mxu0 %vm1313_vm13, %v1301_v1  ;;  %v1292_v2 = vsel %vm656_vm5, %v1976_v0, %v1283_v49  ;;  %v1303_v6 = vsel %vm1299_vm12, %v1298_v3, 0.0 }
 0x43a   : > { %v1297_v4 = vsel %vm1294_vm11, %v1292_v2, 1.0 }
 0x43b   : > { %v1302_v5 = vsel %vm1299_vm12, %v1297_v4, 0.0 }
 0x43c   : > { %1934 = vmatprep.mubr.msk.f32.mxu0 %vm1313_vm13, %v1302_v5 }
 0x43d   : > { %1935 = vmatmul.mubr.msk.f32.gmra.mxu0 %vm1313_vm13, %v1303_v6 }
 0x4f9   : > { %v1933_v9 = vpop.f32.mrf.mxu0 }
 0x4fa   : > { %vm1412_vm14 = vcmp.ge.f32.partialorder %v1933_v9, 0.0  ;;  %v1416_v61 = vmul.f32 0.01, %v1933_v9 }
 0x4fb   : > { %v1392_v62 = vpop.f32.mrf.mxu0 }
 0x4fc   : > { %v1420_v10 = vsel %vm1412_vm14, %v1933_v9, %v1416_v61  ;;  %vm1411_vm15 = vcmp.ge.f32.partialorder %v1392_v62, 0.0  ;;  %v1415_v11 = vmul.f32 0.01, %v1392_v62 }
 0x4fd   : > { %v1936_v12 = vpop.f32.mrf.mxu0  ;;  %v1424_v13 = vsel %vm656_vm5, %v1420_v10, 1.0 }
 0x4fe   : > { %v1419_v14 = vsel %vm1411_vm15, %v1392_v62, %v1415_v11  ;;  %vm1414_vm0 = vcmp.ge.f32.partialorder %v1936_v12, 0.0  ;;  %v1418_v15 = vmul.f32 0.01, %v1936_v12  ;;  %v1428_v21 = vsel %vm1040_vm4, %v1424_v13, 0.0 }
 0x4ff   : > { %v1402_v16 = vpop.f32.mrf.mxu0  ;;  %v1423_v17 = vsel %vm656_vm5, %v1419_v14, 1.0 }
 0x500   : > { %v1422_v18 = vsel %vm1414_vm0, %v1936_v12, %v1418_v15  ;;  %vm1413_vm1 = vcmp.ge.f32.partialorder %v1402_v16, 0.0  ;;  %v1417_v19 = vmul.f32 0.01, %v1402_v16  ;;  %v1427_v20 = vsel %vm1040_vm4, %v1423_v17, 0.0 }
 0x501   : > { %1947 = vmatprep.mubr.msk.f32.mxu1 %vm1050_vm6, %v1427_v20  ;;  %v1426_v23 = vsel %vm656_vm5, %v1422_v18, 1.0 }
 0x502   : > { %v1421_v22 = vsel %vm1413_vm1, %v1402_v16, %v1417_v19  ;;  %1948 = vmatmul.mubr.msk.f32.vlgmr.msra.gmra.mxu1 %vm1050_vm6, %v1428_v21  ;;  %v1430_v26 = vsel %vm1040_vm4, %v1426_v23, 0.0 }
 0x503   : > { %v1425_v24 = vsel %vm656_vm5, %v1421_v22, 1.0  ;;  %vm1537_vm5 = vcmask 130048  }
 0x504   : > { %v1429_v25 = vsel %vm1040_vm4, %v1425_v24, 0.0 }
 0x505   : > { %1950 = vmatprep.mubr.msk.f32.mxu1 %vm1050_vm6, %v1429_v25 }
 0x506   : > { %1951 = vmatmul.mubr.msk.f32.gmra.mxu1 %vm1050_vm6, %v1430_v26 }
 0x5c2   : > { %v1949_v27 = vpop.f32.mrf.mxu1 }
 0x5c3   : > { %1977 = vtanh.f32 %v1949_v27 }
 0x5c4   : > { %v1514_v28 = vpop.f32.mrf.mxu1 }
 0x5c5   : > { %1979 = vtanh.f32 %v1514_v28 }
 0x5c6   : > { %v1952_v29 = vpop.f32.mrf.mxu1 }
 0x5c7   : > { %1981 = vtanh.f32 %v1952_v29 }
 0x5c8   : > { %v1524_v30 = vpop.f32.mrf.mxu1 }
 0x5c9   : > { %1983 = vtanh.f32 %v1524_v30 }
 0x5d0   : > { %v1978_v31 = vpop.eup %1977 }
 0x5d1   : > { %1539 = vst.msk [vmem:[%s243_s13 + $0x8] sm:$0xff] %vm1537_vm5, %v1978_v31 }
 0x5d2   : > { %v1980_v32 = vpop.eup %1979 }
 0x5d3   : > { %1538 = vst.msk [vmem:[%s243_s13] sm:$0xff] %vm1537_vm5, %v1980_v32 }
 0x5d4   : > { %v1982_v33 = vpop.eup %1981 }
 0x5d5   : > { %1541 = vst.msk [vmem:[%s243_s13 + $0x18] sm:$0xff] %vm1537_vm5, %v1982_v33 }
 0x5d6   : > { %v1984_v34 = vpop.eup %1983 }
 0x5d7   : > { %1540 = vst.msk [vmem:[%s243_s13 + $0x10] sm:$0xff] %vm1537_vm5, %v1984_v34 }
 0x5d8 PF: > { %s14_s15 = sadd.s32 1, %s1991_s15  }
 0x5d9   : > { %p11_p5 = scmp.ge.s32.totalorder %s14_s15, 6  }
 0x5db   :  { %13 = sbr.rel (!%p11_p5) target bundleno = 1 (0x1), region = 72 }

</bundles_post_ra>
